<compile_context>
chip_gen: v5e
topology: v5e:2x2
jax: 0.10.0
libtpu: 0.0.40
codegen_flags: <defaults>
</compile_context>

<pallas_src>
import jax
import jax.numpy as jnp
from jax.experimental import pallas as pl
from jax.experimental.pallas import tpu as pltpu

_LANE = 128
_V5E_TARGET = 5 * 1024 * 1024 // 2   # 2.5 MiB: 6x target fits 16 MiB default scoped VMEM
_V6E_V7X_TARGET = 5 * 1024 * 1024    # 5 MiB:   6x target fits 32 MiB default scoped VMEM


def _default_block_target_bytes() -> int:
    """Per-generation x/out block byte target.

    Sized so the worst-case double-buffered footprint (2*x_blk + 2*out_blk +
    2*enc_blk <= 6*target) stays inside the default scoped-VMEM budget of
    every generation without a vmem_limit_bytes override.
    """
    target = _V5E_TARGET  # conservative fallback, safe on every generation
    try:
        name = str(pltpu.get_tpu_info().chip_version).lower()
        # v6e/v7x: 32 MiB default scoped VMEM -> bigger blocks amortize the
        # ~0.35us per-grid-step overhead (matters most at v7x's ~3.2 TB/s HBM).
        if any(tag in name for tag in ("v6", "v7", "6e", "7x")):
            target = _V6E_V7X_TARGET
    except Exception:
        pass
    return target


def _pos_enc_kernel(x_ref, enc_ref, o_ref):
    # x_ref: (tb, tl) batch-chunk; enc_ref: (1, tl) shared encoding slab.
    # Broadcast add over the leading (batch) axis; jnp promotes mixed dtypes
    # exactly like `x + self.encoding` does in PyTorch.
    o_ref[...] = (x_ref[...] + enc_ref[...]).astype(o_ref.dtype)


def position_encoding(x: jax.Array, encoding: jax.Array, *,
                      donate_x: bool = False,
                      block_target_bytes: int | None = None) -> jax.Array:
    """PositionEncoding.forward: x (B, F, D) + encoding (1, F, D) -> (B, F, D)."""
    B, F, D = x.shape
    if encoding.shape != (1, F, D):
        raise ValueError(f"encoding shape {encoding.shape} != {(1, F, D)}")

    out_dtype = jnp.promote_types(x.dtype, encoding.dtype)
    L = F * D

    # Metadata-only collapse to 2D: lane-dense rows, no pad/slice of x.
    x2 = x.reshape(B, L)
    e2 = encoding.reshape(1, L)

    x_item = jnp.dtype(x.dtype).itemsize
    e_item = jnp.dtype(encoding.dtype).itemsize
    o_item = jnp.dtype(out_dtype).itemsize
    max_item = max(x_item, e_item, o_item)
    # Sublane packing factor of the narrowest dtype (8 f32, 16 bf16, 32 int8).
    sub = max(8, 32 // min(x_item, e_item, o_item))

    target = int(block_target_bytes) if block_target_bytes else _default_block_target_bytes()
    row_bytes = L * max_item
    base_rows = min(B, sub)

    if base_rows * row_bytes <= target:
        # Whole rows per block: last block dim == full array extent (allowed
        # even when F*D % 128 != 0 -> only the final lane group is masked).
        tl, nl = L, 1
        tb = target // row_bytes
        if tb >= B:
            tb = B
        else:
            tb = max(base_rows, (tb // sub) * sub)  # keep sublane packing full
        nb = pl.cdiv(B, tb)
    else:
        # A single row-group would blow the block budget: also tile the
        # collapsed lane axis in 128-lane multiples (partial tail is masked).
        tb = base_rows
        tl = max(_LANE, (target // (tb * max_item)) // _LANE * _LANE)
        nl = pl.cdiv(L, tl)
        nb = pl.cdiv(B, tb)

    extra_kwargs = {}
    if donate_x and out_dtype == x.dtype:
        # x block shape / index map match the output exactly -> safe in-place
        # update when the caller donates x (removes the extra output alloc).
        extra_kwargs["input_output_aliases"] = {0: 0}

    out2 = pl.pallas_call(
        _pos_enc_kernel,
        out_shape=jax.ShapeDtypeStruct((B, L), out_dtype),
        grid_spec=pltpu.PrefetchScalarGridSpec(
            num_scalar_prefetch=0,
            grid=(nb, nl),
            in_specs=[
                # (tb, tl) slab of collapsed rows per grid step.
                pl.BlockSpec((tb, tl), lambda i, j: (i, j)),
                # Encoding: batch-constant block index -> fetched once per
                # lane chunk, never re-DMA'd across batch chunks.
                pl.BlockSpec((1, tl), lambda i, j: (0, j)),
            ],
            out_specs=pl.BlockSpec((tb, tl), lambda i, j: (i, j)),
        ),
        compiler_params=pltpu.CompilerParams(
            # No output block is revisited -> both axes parallel; on v7x the
            # two TensorCores can each stream independent chunks.
            dimension_semantics=("parallel", "parallel"),
        ),
        cost_estimate=pl.CostEstimate(
            flops=B * L,
            transcendentals=0,
            bytes_accessed=B * L * (x_item + o_item) + L * e_item,
        ),
        **extra_kwargs,
    )(x2, e2)

    return out2.reshape(B, F, D)


if __name__ == "__main__":
    key = jax.random.PRNGKey(0)

    def run_case(B, F, D, x_dtype=jnp.float32, enc_dtype=jnp.float32,
                 block_target_bytes=None):
        kx, ke = jax.random.split(jax.random.fold_in(key, B * 100003 + F * 131 + D))
        x = jax.random.normal(kx, (B, F, D), dtype=jnp.float32).astype(x_dtype)
        # Deterministic "parameter" matching torch.randn(1, F, D) / 100.
        encoding = (jax.random.normal(ke, (1, F, D), dtype=jnp.float32) / 100.0
                    ).astype(enc_dtype)
        out = jax.block_until_ready(
            position_encoding(x, encoding, block_target_bytes=block_target_bytes))
        ref = x + encoding  # same broadcast + dtype promotion as torch
        assert out.shape == ref.shape and out.dtype == ref.dtype, (out.shape, out.dtype)
        assert jnp.allclose(out, ref, atol=1e-6), f"mismatch (B={B},F={F},D={D})"

    # Module-default depth=100: F*D=800 as full-extent last dim (masked tail lanes only).
    run_case(B=2, F=8, D=100)
    # Lane-dense depth (multiple of 128): fully unmasked stores.
    run_case(B=2, F=8, D=128)
    # Multi-block batch-tiling path (tb rounded to a sublane multiple).
    run_case(B=64, F=8, D=100, block_target_bytes=32 * 1024)
    # Lane-tiling path (single row-group exceeds the block budget).
    run_case(B=4, F=8, D=100, block_target_bytes=4 * 1024)
    # Mixed-dtype promotion path, matching torch's `x + encoding`.
    run_case(B=2, F=8, D=100, x_dtype=jnp.bfloat16, enc_dtype=jnp.float32)

    print("KERNEL_OK")
</pallas_src>

<mosaic_0001>
module attributes {stable_mosaic.version = 11 : i64} {
  func.func @_pos_enc_kernel(%arg0: i32, %arg1: i32, %arg2: memref<2x800xf32, #tpu.memory_space<vmem>>, %arg3: memref<1x800xf32, #tpu.memory_space<vmem>>, %arg4: memref<2x800xf32, #tpu.memory_space<vmem>>) attributes {dimension_semantics = [#tpu.dimension_semantics<parallel>, #tpu.dimension_semantics<parallel>], iteration_bounds = array<i64: 1, 1>, scalar_prefetch = 0 : i64, scratch_operands = 0 : i64, tpu.core_type = #tpu.core_type<tc>, window_params = [{transform_indices = @transform_0, window_bounds = array<i64: 2, 800>}, {transform_indices = @transform_1, window_bounds = array<i64: 1, 800>}, {transform_indices = @transform_2, window_bounds = array<i64: 2, 800>}]} {
    %c0 = arith.constant 0 : index
    %c0_0 = arith.constant 0 : index
    %0 = vector.load %arg2[%c0, %c0_0] : memref<2x800xf32, #tpu.memory_space<vmem>>, vector<2x800xf32>
    %c0_1 = arith.constant 0 : index
    %c0_2 = arith.constant 0 : index
    %1 = vector.load %arg3[%c0_1, %c0_2] : memref<1x800xf32, #tpu.memory_space<vmem>>, vector<1x800xf32>
    %2 = vector.broadcast %1 : vector<1x800xf32> to vector<2x800xf32>
    %3 = arith.addf %0, %2 : vector<2x800xf32>
    %c0_3 = arith.constant 0 : index
    %c0_4 = arith.constant 0 : index
    %4 = vector.load %arg4[%c0_3, %c0_4] : memref<2x800xf32, #tpu.memory_space<vmem>>, vector<2x800xf32>
    tpu.vector_store %arg4[%c0_3, %c0_4], %3 {strides = array<i32>} : memref<2x800xf32, #tpu.memory_space<vmem>>, vector<2x800xf32>,
    return
  }
  func.func @transform_0(%arg0: i32, %arg1: i32) -> (i32, i32) {
    %c0_i32 = arith.constant 0 : i32
    return %arg0, %arg1 : i32, i32
  }
  func.func @transform_1(%arg0: i32, %arg1: i32) -> (i32, i32) {
    %c0_i32 = arith.constant 0 : i32
    %c0_i32_0 = arith.constant 0 : i32
    return %c0_i32, %arg1 : i32, i32
  }
  func.func @transform_2(%arg0: i32, %arg1: i32) -> (i32, i32) {
    %c0_i32 = arith.constant 0 : i32
    return %arg0, %arg1 : i32, i32
  }
}

</mosaic_0001>

<bundles_post_ra>
// kernel: tpu_custom_call.1
= control target key start
LH: loop header
LB: loop body
LE: loop exit
PB: predicated region body
PF: predicated region fallthrough
CT: control target
= control target key end

     0   :  { %7 = vsyncpa [#allocation3], 0  ;;  %s204_s0 = inlined_call_operand.hbm [shape: f32[2,800], index: 0, kind: input, shape index: {}]   ;;  %s205_s1 = inlined_call_operand.hbm [shape: f32[1,800], index: 1, kind: input, shape index: {}]   ;;  %s206_s2 = inlined_call_operand.hbm [shape: f32[2,800], index: 2, kind: output, shape index: {}]  }
   0x1   :  { %8 = vsyncpa [#allocation6], 0 }
   0x2   :  { %9 = vsyncpa [#allocation4], 0  ;;  %s15_s11 = sshll.u32 %s204_s0, 4  ;;  %s173_s12 = smov [#allocation2]   ;;  %s16_s11 = int_to_ptr.hbm [resolvable:$true] %s15_s11 }
   0x3   :  { %s17_s13 = sshll.u32 %s173_s12, 4  ;;  %s26_s16 = sshll.u32 %s205_s1, 4  ;;  %s18_s13 = int_to_ptr.vmem [resolvable:$true] %s17_s13  ;;  %s27_s16 = int_to_ptr.hbm [resolvable:$true] %s26_s16 }
   0x4   :  { %20 = dma.hbm_to_vmem [thread:$0]  %s16_s11, 224, %s18_s13, [#allocation3]  }
   0x5   :  { %s174_s17 = smov [#allocation5]  }
   0x6   :  { %s28_s18 = sshll.u32 %s174_s17, 4  ;;  %s29_s18 = int_to_ptr.vmem [resolvable:$true] %s28_s18 }
   0x7   :  { %31 = dma.hbm_to_vmem [thread:$0]  %s27_s16, 112, %s29_s18, [#allocation6]  }
   0x8   :  { %167 = dma.done.wait [#allocation3], 224  }
   0x9   :  { %168 = vsyncadd [#allocation3], 4294967072 }
   0xa   :  { %169 = dma.done.wait [#allocation6], 112  }
   0xb   :  { %170 = vsyncadd [#allocation6], 4294967184  ;;  %v42_v0 = vld [vmem:[#allocation5] sm:$0x7f]  ;;  %vm56_vm0 = vcmask 1041408   ;;  %vm69_vm1 = vcmask 1043458  }
   0xc   :  { %v44_v1 = vperm.slane %v42_v0, 0  ;;  %v45_v2 = vperm.slane %v42_v0, 1  ;;  %v46_v3 = vperm.slane %v42_v0, 2  ;;  %v47_v4 = vperm.slane %v42_v0, 3  ;;  %v40_v11 = vld [vmem:[#allocation2] sm:$0xff]  ;;  %vm70_vm4 = vmor %vm69_vm1, %vm56_vm0  ;;  %s175_s0 = smov [#allocation7]  }
   0xd   :  { %vm58_vm2 = vcmask 1045508   ;;  %v48_v5 = vperm.slane %v42_v0, 4  ;;  %v49_v6 = vperm.slane %v42_v0, 5  ;;  %v50_v7 = vperm.slane %v42_v0, 6  ;;  %v41_v16 = vld [vmem:[#allocation2 + $0x8] sm:$0x3f] }
   0xe   :  { %v51_v8 = vrot.slane %v45_v2, 6  ;;  %v52_v9 = vrot.slane %v46_v3, 4  ;;  %v53_v10 = vrot.slane %v47_v4, 2  ;;  %vm60_vm3 = vcmask 1043456   ;;  %s79_s1 = sshll.u32 %s175_s0, 4  ;;  %s81_s21 = sshll.u32 %s206_s2, 4  ;;  %s80_s1 = int_to_ptr.vmem [resolvable:$true] %s79_s1  ;;  %s82_s21 = int_to_ptr.hbm [resolvable:$true] %s81_s21 }
   0xf   :  { %v54_v12 = vrot.slane %v49_v6, 6  ;;  %v55_v13 = vrot.slane %v50_v7, 4  ;;  %vm71_vm5 = vcmask 259076  }
  0x10   :  { %v57_v14 = vsel %vm56_vm0, %v44_v1, %v51_v8  ;;  %v59_v15 = vsel %vm58_vm2, %v52_v9, %v53_v10  ;;  %vm72_vm6 = vmor %vm71_vm5, %vm70_vm4 }
  0x11   :  { %v61_v17 = vsel %vm60_vm3, %v57_v14, %v59_v15  ;;  %v62_v18 = vsel %vm56_vm0, %v48_v5, %v54_v12 }
  0x12   :  { %v66_v19 = vadd.f32 %v61_v17, %v40_v11  ;;  %v63_v20 = vsel %vm60_vm3, %v62_v18, %v55_v13 }
  0x13   :  { %v67_v21 = vadd.f32 %v63_v20, %v41_v16 }
  0x14   :  { %68 = vst [vmem:[#allocation7] sm:$0xff] %v66_v19 }
  0x15   :  { %73 = vst.msk [vmem:[#allocation7 + $0x8] sm:$0x3f] %vm72_vm6, %v67_v21 }
  0x16   :  { %84 = dma.vmem_to_hbm [thread:$0]  %s80_s1, 224, %s82_s21, [#allocation4]  }
  0x17   :  { %171 = dma.done.wait [#allocation4], 224  }
  0x18   :  { %172 = vsyncadd [#allocation4], 4294967072 }
  0x19   :  { %89 = vsyncpa [#allocation3], 1 }
  0x1a   :  { %90 = vsyncpa [#allocation6], 1 }
  0x1b   :  { %91 = vsyncpa [#allocation4], 1 }

</bundles_post_ra>
